<compile_context>
chip_gen: v7x
topology: tpu7x:2x2x1
jax: 0.10.0
libtpu: 0.0.40
codegen_flags: <defaults>
</compile_context>

<pallas_src>
import jax
import jax.numpy as jnp
from jax import lax
from jax.experimental import pallas as pl
from jax.experimental.pallas import tpu as pltpu

# ---- module hyper-parameters (from __init__) ---------------------------------
NUM_BINS = 32
MIN_VALUE = -1.0
MAX_VALUE = 1.0
BIN_WIDTH = (MAX_VALUE - MIN_VALUE) / NUM_BINS
INV_BIN_WIDTH = 1.0 / BIN_WIDTH          # 16.0 exactly — multiply == divide here
# bin_centers buffer exists in the PyTorch module but is unused in forward().

TILE_B_DEFAULT = 32768  # batch lanes per grid step (multiple of 128)


def _discretized_nll_kernel(logits_ref, targets_ref, out_ref):
    """Per-row cross-entropy against discretized targets (lane-dense layout).

    logits_ref : [NUM_BINS, TILE_B]  bins on sublanes, batch on lanes
    targets_ref: [1, TILE_B]         continuous targets
    out_ref    : [1, TILE_B]         per-row loss (f32), dense lane store
    """
    x = logits_ref[...].astype(jnp.float32)            # [C, T]
    t = targets_ref[...].astype(jnp.float32)           # [1, T]

    # discretize: trunc((t - min) * inv_width) then clamp — matches
    # .long().clamp(0, C-1) (f32->i32 conversion truncates toward zero).
    idx = jnp.clip(((t - MIN_VALUE) * INV_BIN_WIDTH).astype(jnp.int32),
                   0, NUM_BINS - 1)                     # [1, T]

    # pick logits[i, idx_i] via masked sublane reduce (no dynamic gather,
    # no one-hot float multiply)
    bins = lax.broadcasted_iota(jnp.int32, x.shape, 0)  # [C, T]
    picked = jnp.sum(jnp.where(bins == idx, x, 0.0),
                     axis=0, keepdims=True)             # [1, T]

    # numerically stable log-sum-exp over the bin (sublane) axis
    m = jnp.max(x, axis=0, keepdims=True)                               # [1, T]
    lse = m + jnp.log(jnp.sum(jnp.exp(x - m), axis=0, keepdims=True))   # [1, T]

    out_ref[...] = lse - picked                          # per-row NLL


def discretized_nll_loss(logits, targets, *, tile_b=TILE_B_DEFAULT):
    """logits: [B, NUM_BINS] float, targets: [B, 1] float -> scalar f32 loss."""
    B, C = logits.shape
    assert C == NUM_BINS

    # Lane-dense relayout (layout plumbing only; dtype preserved, no pre-cast).
    logits_t = logits.T                    # [C, B]
    targets_t = targets.reshape(1, B)      # [1, B]

    if B >= tile_b:
        tile = max(128, (tile_b // 128) * 128)   # keep dense (8,128) blocks
    else:
        tile = B                                  # single block == full array
    num_tiles = pl.cdiv(B, tile)

    in_itemsize = jnp.dtype(logits.dtype).itemsize
    t_itemsize = jnp.dtype(targets.dtype).itemsize
    # double-buffered block bytes (2 inputs + 1 output) + headroom; keep well
    # under v7x's 64 MiB/TC physical VMEM.
    block_bytes = 2 * (C * tile * in_itemsize + tile * t_itemsize + tile * 4)
    vmem_limit = int(min(48 * 1024 * 1024, max(4 * block_bytes, 8 * 1024 * 1024)))

    cost = pl.CostEstimate(
        flops=6 * B * C,
        transcendentals=B * C + B,
        bytes_accessed=B * C * in_itemsize + B * t_itemsize + B * 4,
    )

    per_row = pl.pallas_call(
        _discretized_nll_kernel,
        out_shape=jax.ShapeDtypeStruct((1, B), jnp.float32),
        grid=(num_tiles,),
        in_specs=[
            pl.BlockSpec((C, tile), lambda i: (0, i)),
            pl.BlockSpec((1, tile), lambda i: (0, i)),
        ],
        out_specs=pl.BlockSpec((1, tile), lambda i: (0, i)),
        compiler_params=pltpu.CompilerParams(
            dimension_semantics=("parallel",),
            vmem_limit_bytes=vmem_limit,
        ),
        cost_estimate=cost,
    )(logits_t, targets_t)

    # tiny final reduce outside the kernel; divide by the GLOBAL batch size.
    return jnp.sum(per_row) / jnp.float32(B)


def _reference(logits, targets):
    """Pure-JAX reference for the same semantics."""
    idx = jnp.clip(((targets - MIN_VALUE) / BIN_WIDTH).astype(jnp.int32),
                   0, NUM_BINS - 1)[:, 0]
    logp = jax.nn.log_softmax(logits.astype(jnp.float32), axis=-1)
    picked = jnp.take_along_axis(logp, idx[:, None], axis=-1)[:, 0]
    return -jnp.mean(picked)


if __name__ == "__main__":
    key = jax.random.PRNGKey(0)
    k1, k2, k3, k4 = jax.random.split(key, 4)

    # small shapes consistent with the module: logits [B, num_bins], targets [B, 1]
    B = 8
    logits = jax.random.normal(k1, (B, NUM_BINS), dtype=jnp.float32)
    # targets slightly wider than [min, max] to exercise clamping
    targets = jax.random.uniform(k2, (B, 1), dtype=jnp.float32,
                                 minval=MIN_VALUE - 0.2, maxval=MAX_VALUE + 0.2)
    loss = jax.block_until_ready(discretized_nll_loss(logits, targets))
    ref = _reference(logits, targets)
    assert jnp.allclose(loss, ref, atol=1e-5, rtol=1e-5), (loss, ref)

    # exercise the gridded path with a tail tile (B not a multiple of the tile)
    B2 = 300
    logits2 = jax.random.normal(k3, (B2, NUM_BINS), dtype=jnp.float32)
    targets2 = jax.random.uniform(k4, (B2, 1), dtype=jnp.float32,
                                  minval=MIN_VALUE - 0.2, maxval=MAX_VALUE + 0.2)
    loss2 = jax.block_until_ready(discretized_nll_loss(logits2, targets2, tile_b=128))
    ref2 = _reference(logits2, targets2)
    assert jnp.allclose(loss2, ref2, atol=1e-5, rtol=1e-5), (loss2, ref2)

    # TODO(synk): loss_fn is a constructor argument in the PyTorch module; it is
    # fixed here to cross-entropy (log-softmax + NLL, mean reduction).
    print("KERNEL_OK")
</pallas_src>

<mosaic_0001>
module attributes {stable_mosaic.version = 11 : i64} {
  func.func @_discretized_nll_kernel(%arg0: i32, %arg1: memref<32x8xf32, #tpu.memory_space<vmem>>, %arg2: memref<1x8xf32, #tpu.memory_space<vmem>>, %arg3: memref<1x8xf32, #tpu.memory_space<vmem>>) attributes {dimension_semantics = [#tpu.dimension_semantics<parallel>], iteration_bounds = array<i64: 1>, scalar_prefetch = 0 : i64, scratch_operands = 0 : i64, tpu.core_type = #tpu.core_type<tc>, window_params = [{transform_indices = @transform_0, window_bounds = array<i64: 32, 8>}, {transform_indices = @transform_1, window_bounds = array<i64: 1, 8>}, {transform_indices = @transform_2, window_bounds = array<i64: 1, 8>}]} {
    %c0 = arith.constant 0 : index
    %c0_0 = arith.constant 0 : index
    %0 = vector.load %arg1[%c0, %c0_0] : memref<32x8xf32, #tpu.memory_space<vmem>>, vector<32x8xf32>
    %c0_1 = arith.constant 0 : index
    %c0_2 = arith.constant 0 : index
    %1 = vector.load %arg2[%c0_1, %c0_2] : memref<1x8xf32, #tpu.memory_space<vmem>>, vector<1x8xf32>
    %cst = arith.constant -1.000000e+00 : f32
    %2 = vector.broadcast %cst : f32 to vector<1x8xf32>
    %3 = arith.subf %1, %2 : vector<1x8xf32>
    %cst_3 = arith.constant 1.600000e+01 : f32
    %4 = vector.broadcast %cst_3 : f32 to vector<1x8xf32>
    %5 = arith.mulf %3, %4 : vector<1x8xf32>
    %6 = arith.fptosi %5 : vector<1x8xf32> to vector<1x8xi32>
    %c0_i32 = arith.constant 0 : i32
    %c31_i32 = arith.constant 31 : i32
    %7 = vector.broadcast %c0_i32 : i32 to vector<1x8xi32>
    %8 = arith.maxsi %7, %6 : vector<1x8xi32>
    %9 = vector.broadcast %c31_i32 : i32 to vector<1x8xi32>
    %10 = arith.minsi %9, %8 : vector<1x8xi32>
    %11 = tpu.iota {dimensions = array<i32: 0>} : vector<32x8xi32>
    %12 = vector.broadcast %10 : vector<1x8xi32> to vector<32x8xi32>
    %13 = arith.cmpi eq, %11, %12 : vector<32x8xi32>
    %cst_4 = arith.constant 0.000000e+00 : f32
    %14 = vector.broadcast %cst_4 : f32 to vector<32x8xf32>
    %15 = arith.select %13, %0, %14 : vector<32x8xi1>, vector<32x8xf32>
    %cst_5 = arith.constant dense<0.000000e+00> : vector<8xf32>
    %16 = vector.multi_reduction <add>, %15, %cst_5 [0] : vector<32x8xf32> to vector<8xf32>
    %17 = vector.shape_cast %16 : vector<8xf32> to vector<1x8xf32>
    %cst_6 = arith.constant dense<0xFF800000> : vector<8xf32>
    %18 = vector.multi_reduction <maximumf>, %0, %cst_6 [0] : vector<32x8xf32> to vector<8xf32>
    %19 = vector.shape_cast %18 : vector<8xf32> to vector<1x8xf32>
    %20 = vector.broadcast %19 : vector<1x8xf32> to vector<32x8xf32>
    %21 = arith.subf %0, %20 : vector<32x8xf32>
    %22 = math.exp %21 : vector<32x8xf32>
    %cst_7 = arith.constant dense<0.000000e+00> : vector<8xf32>
    %23 = vector.multi_reduction <add>, %22, %cst_7 [0] : vector<32x8xf32> to vector<8xf32>
    %24 = vector.shape_cast %23 : vector<8xf32> to vector<1x8xf32>
    %25 = math.log %24 : vector<1x8xf32>
    %26 = arith.addf %19, %25 : vector<1x8xf32>
    %27 = arith.subf %26, %17 : vector<1x8xf32>
    %c0_8 = arith.constant 0 : index
    %c0_9 = arith.constant 0 : index
    %28 = vector.load %arg3[%c0_8, %c0_9] : memref<1x8xf32, #tpu.memory_space<vmem>>, vector<1x8xf32>
    tpu.vector_store %arg3[%c0_8, %c0_9], %27 {strides = array<i32>} : memref<1x8xf32, #tpu.memory_space<vmem>>, vector<1x8xf32>,
    return
  }
  func.func @transform_0(%arg0: i32) -> (i32, i32) {
    %c0_i32 = arith.constant 0 : i32
    %c0_i32_0 = arith.constant 0 : i32
    return %c0_i32, %arg0 : i32, i32
  }
  func.func @transform_1(%arg0: i32) -> (i32, i32) {
    %c0_i32 = arith.constant 0 : i32
    %c0_i32_0 = arith.constant 0 : i32
    return %c0_i32, %arg0 : i32, i32
  }
  func.func @transform_2(%arg0: i32) -> (i32, i32) {
    %c0_i32 = arith.constant 0 : i32
    %c0_i32_0 = arith.constant 0 : i32
    return %c0_i32, %arg0 : i32, i32
  }
}

</mosaic_0001>

<bundles_post_ra>
// kernel: tpu_custom_call.1
= control target key start
LH: loop header
LB: loop body
LE: loop exit
PB: predicated region body
PF: predicated region fallthrough
CT: control target
= control target key end

     0   :  { %vm41_vm0 = vcmask 64512   ;;  %s206_s0 = inlined_call_operand.vmem [shape: f32[32,8], index: 0, kind: input, shape index: {}]   ;;  %s207_s1 = inlined_call_operand.vmem [shape: f32[1,8], index: 1, kind: input, shape index: {}]   ;;  %s208_s2 = inlined_call_operand.hbm [shape: f32[1,8], index: 2, kind: output, shape index: {}]  }
   0x1   :  { %v12_v0 = vld [vmem:[%s206_s0] sm:$0xff]  ;;  %v13_v1 = vld [vmem:[%s206_s0 + $0x8] sm:$0xff]  ;;  %v14_v2 = vld [vmem:[%s206_s0 + $0x10] sm:$0xff] }
   0x2   :  { %v15_v3 = vld [vmem:[%s206_s0 + $0x18] sm:$0xff]  ;;  %v16_v4 = vld [vmem:[%s207_s1] sm:$0x1]  ;;  %v55_v5 = vsel %vm41_vm0, %v12_v0, -inf  ;;  %v56_v6 = vsel %vm41_vm0, %v13_v1, -inf  ;;  %v57_v7 = vsel %vm41_vm0, %v14_v2, -inf }
   0x3   :  { %v113_v8 = vadd.f32 1.0, %v16_v4  ;;  %v58_v9 = vsel %vm41_vm0, %v15_v3, -inf  ;;  %v59_v10 = vmax.f32 %v55_v5, %v56_v6 }
   0x4   :  { %7 = vsyncpa [#allocation3], 0  ;;  %v60_v11 = vmax.f32 %v57_v7, %v58_v9  ;;  %v24_v18 = vlaneseq  ;;  %s151_s0 = smov [#allocation2]   ;;  %vm97_vm7 = vcmask 57344  }
   0x5   :  { %v18_v12 = vmul.f32 16.0, %v113_v8  ;;  %s105_s1 = sshll.u32 %s151_s0, 4  ;;  %s106_s1 = int_to_ptr.vmem [resolvable:$true] %s105_s1 }
   0x6   :  { %v61_v13 = vmax.f32 %v59_v10, %v60_v11  ;;  %v25_v22 = vshrl.u32 %v24_v18, 7  ;;  %s127_s19 = scalar_lea.vmem %s106_s1, 16  ;;  %s131_s20 = scalar_lea.vmem %s106_s1, 32 }
   0x7   :  { %v114_v14 = vtrunc.f32 %v18_v12  ;;  %p128_p0 = scmp.ne.s32.totalorder %s106_s1, %s127_s19  ;;  %p132_p1 = scmp.lt.s32.totalorder %s106_s1, %s106_s1 }
   0x8   :  { %v62_v15 = vrot.slane %v61_v13, 4  ;;  %v31_v24 = vsub.s32 0, %v25_v22  ;;  %v26_v30 = vadd.s32 8, %v25_v22  ;;  %v27_v37 = vadd.s32 16, %v25_v22  ;;  %p133_p2 = scmp.lt.s32.totalorder %s131_s20, %s127_s19 }
   0x9   :  { %v115_v16 = vcvt.f32.s32 %v114_v14  ;;  %v28_v40 = vadd.s32 24, %v25_v22 }
   0xa   :  { %v63_v17 = vmax.f32 %v61_v13, %v62_v15  ;;  %p134_p3 = por %p133_p2, %p132_p1 }
   0xb   :  { %vm20_vm1 = vcmp.gt.s32.totalorder %v115_v16, 0 }
   0xc   :  { %v64_v19 = vrot.slane %v63_v17, 2  ;;  %v21_v20 = vsel %vm20_vm1, %v115_v16, 0  ;;  %p135_p4 = pnand %p134_p3, %p128_p0 }
   0xd   :  { %vm22_vm2 = vcmp.lt.s32.totalorder %v21_v20, 31 }
   0xe   :  { %v65_v21 = vmax.f32 %v63_v17, %v64_v19  ;;  %v23_v25 = vsel %vm22_vm2, %v21_v20, 31 }
   0xf   :  { %v32_v31 = vrot.slane %v23_v25, %v31_v24 }
  0x10   :  { %v66_v23 = vrot.slane %v65_v21, 1 }
  0x11   :  { %vm33_vm3 = vcmp.eq.s32.totalorder %v25_v22, %v32_v31  ;;  %vm34_vm4 = vcmp.eq.s32.totalorder %v26_v30, %v32_v31  ;;  %vm35_vm5 = vcmp.eq.s32.totalorder %v27_v37, %v32_v31  ;;  %vm36_vm6 = vcmp.eq.s32.totalorder %v28_v40, %v32_v31 }
  0x12   :  { %v67_v26 = vmax.f32 %v65_v21, %v66_v23  ;;  %v37_v38 = vsel %vm33_vm3, %v12_v0, 0.0  ;;  %v38_v39 = vsel %vm34_vm4, %v13_v1, 0.0  ;;  %v39_v43 = vsel %vm35_vm5, %v14_v2, 0.0 }
  0x13   :  { %v42_v41 = vsel %vm41_vm0, %v37_v38, 0.0  ;;  %v43_v42 = vsel %vm41_vm0, %v38_v39, 0.0  ;;  %v45_v47 = vsel %vm41_vm0, %v39_v43, 0.0  ;;  %v40_v50 = vsel %vm36_vm6, %v15_v3, 0.0 }
  0x14   :  { %v68_v27 = vsub.f32 %v12_v0, %v67_v26  ;;  %v69_v28 = vsub.f32 %v13_v1, %v67_v26  ;;  %v70_v29 = vsub.f32 %v14_v2, %v67_v26  ;;  %v71_v32 = vsub.f32 %v15_v3, %v67_v26 }
  0x15   :  { %v44_v45 = vadd.f32 %v43_v42, %v42_v41  ;;  %v47_v57 = vsel %vm41_vm0, %v40_v50, 0.0 }
  0x16   :  { %v72_v33 = vmul.f32 1.442695, %v68_v27  ;;  %v74_v34 = vmul.f32 1.442695, %v69_v28  ;;  %v76_v35 = vmul.f32 1.442695, %v70_v29 }
  0x17   :  { %v78_v36 = vmul.f32 1.442695, %v71_v32  ;;  %v46_v55 = vadd.f32 %v45_v47, %v44_v45 }
  0x18   :  { %117 = vpow2.f32 %v72_v33 }
  0x19   :  { %119 = vpow2.f32 %v74_v34  ;;  %v48_v60 = vadd.f32 %v47_v57, %v46_v55 }
  0x1a   :  { %121 = vpow2.f32 %v76_v35 }
  0x1b   :  { %123 = vpow2.f32 %v78_v36  ;;  %v49_v63 = vrot.slane %v48_v60, 4 }
  0x1d   :  { %v50_v2 = vadd.f32 %v49_v63, %v48_v60 }
  0x1f   :  { %v51_v5 = vrot.slane %v50_v2, 2 }
  0x21   :  { %v52_v6 = vadd.f32 %v51_v5, %v50_v2 }
  0x22   :  { %v118_v44 = vpop.eup %117 }
  0x23   :  { %v120_v46 = vpop.eup %119  ;;  %v80_v48 = vsel %vm41_vm0, %v118_v44, 0.0  ;;  %v53_v7 = vrot.slane %v52_v6, 1 }
  0x24   :  { %v122_v49 = vpop.eup %121  ;;  %v81_v51 = vsel %vm41_vm0, %v120_v46, 0.0 }
  0x25   :  { %v124_v52 = vpop.eup %123  ;;  %v82_v53 = vadd.f32 %v81_v51, %v80_v48  ;;  %v83_v54 = vsel %vm41_vm0, %v122_v49, 0.0  ;;  %v54_v9 = vadd.f32 %v53_v7, %v52_v6 }
  0x26   :  { %v85_v56 = vsel %vm41_vm0, %v124_v52, 0.0 }
  0x27   :  { %v84_v58 = vadd.f32 %v83_v54, %v82_v53 }
  0x29   :  { %v86_v59 = vadd.f32 %v85_v56, %v84_v58 }
  0x2b   :  { %v87_v61 = vrot.slane %v86_v59, 4 }
  0x2d   :  { %v88_v62 = vadd.f32 %v87_v61, %v86_v59 }
  0x2f   :  { %v89_v0 = vrot.slane %v88_v62, 2 }
  0x31   :  { %v90_v1 = vadd.f32 %v89_v0, %v88_v62 }
  0x33   :  { %v91_v3 = vrot.slane %v90_v1, 1 }
  0x35   :  { %v92_v4 = vadd.f32 %v91_v3, %v90_v1 }
  0x37   :  { %125 = vlog2.f32 %v92_v4 }
  0x41   :  { %v126_v8 = vpop.eup %125 }
  0x42   :  { %v94_v10 = vmul.f32 0.6931472, %v126_v8 }
  0x44   :  { %v95_v11 = vadd.f32 %v94_v10, %v67_v26 }
  0x46   :  { %v96_v12 = vsub.f32 %v95_v11, %v54_v9 }
  0x48   :  { %98 = vst.msk [vmem:[#allocation2] sm:$0x1] %vm97_vm7, %v96_v12 }
  0x49   :  { %138 = shalt.err (!%p135_p4)
}
  0x4a   :  { %s139_s23 = scalar_lea.hbm %s208_s2, 16 }
  0x4b   :  { %p140_p5 = scmp.ne.s32.totalorder %s208_s2, %s139_s23  ;;  %p143_p6 = scmp.lt.u32.totalorder %s139_s23, %s208_s2 }
  0x4d   :  { %p145_p7 = pnand %p143_p6, %p140_p5 }
  0x4f   :  { %148 = shalt.err (!%p145_p7)
}
  0x50   :  { %108 = dma.vmem_to_hbm [thread:$0]  %s106_s1, 16, %s208_s2, [#allocation3]  }
  0x51   :  { %149 = dma.done.wait [#allocation3], 16  }
  0x52   :  { %150 = vsyncadd [#allocation3], 4294967280 }
  0x53   :  { %112 = vsyncpa [#allocation3], 1 }

</bundles_post_ra>
